<compile_context>
chip_gen: v5e
topology: v5e:2x2
jax: 0.10.0
libtpu: 0.0.40
codegen_flags: <defaults>
</compile_context>

<pallas_src>
import functools

import jax
import jax.numpy as jnp
from jax.experimental import pallas as pl
from jax.experimental.pallas import tpu as pltpu


def _round_up(v, m):
    return (v + m - 1) // m * m


def _vmem_budget():
    """Per-core (block-sizing budget, scoped vmem limit) in bytes.

    Derived from the actual chip (v7x: 64 MiB/TC, v5e/v6e: 128 MiB) instead of
    assuming v6e headroom; falls back to a v7x-safe conservative default.
    """
    try:
        cap = int(pltpu.get_tpu_info().vmem_capacity_bytes)
    except Exception:
        cap = 64 * 1024 * 1024
    cap = max(cap, 32 * 1024 * 1024)
    budget = min(int(cap * 0.6), 96 * 1024 * 1024)
    limit = min(int(cap * 0.75), 112 * 1024 * 1024)
    return budget, limit


def _build_patch(x_slab, *, KH, KW, W_pad, width):
    """bf16 (C_in_p, width) slab -> (KH*KW*C_in_p, width) bf16 im2col patch.

    Tap (kh, kw) is a circular left lane-shift by d = kh*W_pad + kw, realised
    on a uint32 view of the bf16 slab (32-bit XLU rotate path: half the rotate
    bytes of an f32 roll, no big f32->bf16 cast, halved vreg pressure).
    Wrapped lanes only land on halo / lane-pad positions, which are masked out
    of the BN statistics and cropped from the output.
    """
    rows = x_slab.shape[0]
    x_u32 = None
    try:
        u32 = pltpu.bitcast(x_slab, jnp.uint32)
        if u32.shape == (rows // 2, width):      # sublane-paired 32-bit view
            x_u32 = u32
    except Exception:
        x_u32 = None
    slabs = []
    for t in range(KH * KW):
        d = (t // KW) * W_pad + (t % KW)         # flat shift of tap (kh, kw)
        if d == 0:
            slabs.append(x_slab)
        elif x_u32 is not None:
            slabs.append(pltpu.bitcast(pltpu.roll(x_u32, width - d, 1),
                                       jnp.bfloat16))
        else:
            # TODO(synk): proven f32 32-bit roll fallback when the packed
            # uint32 view is unavailable on this build.
            slabs.append(pltpu.roll(x_slab.astype(jnp.float32), width - d, 1)
                         .astype(jnp.bfloat16))
    return jnp.concatenate(slabs, axis=0)        # (K_p, width) bf16


def _fused_kernel(x_ref, w_ref, mask_ref, gamma_ref, beta_ref, out_ref,
                  sum_ref, sq_ref, *, B, KH, KW, W_pad, L, count, eps):
    """Conv (one MXU matmul per B-image block) + fully in-VMEM BatchNorm.

    x_ref:      (1, C_in_p, B*L) bf16  B padded images, lane-concatenated
    w_ref:      (C_out, K_p)     bf16  im2col-ordered weights
    mask_ref:   (1, B*L)         f32   1.0 at valid (non-halo) output positions
    gamma/beta: (C_out, 1)       f32
    out_ref:    (N_pad, C_out, L) f32  whole-batch resident output block
                                       (constant index_map -> one HBM store)
    sum/sq:     (C_out, 1)       f32   VMEM scratch accumulated across the grid
    """
    b = pl.program_id(0)

    @pl.when(b == 0)
    def _init():
        sum_ref[...] = jnp.zeros_like(sum_ref)
        sq_ref[...] = jnp.zeros_like(sq_ref)

    patch = _build_patch(x_ref[0], KH=KH, KW=KW, W_pad=W_pad, width=B * L)
    y = jnp.dot(w_ref[...], patch, preferred_element_type=jnp.float32)

    # pre-BN conv rows into the resident output slab (lane-dense stores)
    for i in range(B):
        out_ref[b * B + i] = y[:, i * L:(i + 1) * L]

    # per-channel partial statistics over valid positions only (f32)
    ym = y * mask_ref[...]
    sum_ref[...] += jnp.sum(ym, axis=1, keepdims=True)
    sq_ref[...] += jnp.sum(ym * ym, axis=1, keepdims=True)

    @pl.when(b == pl.num_programs(0) - 1)
    def _finalize():
        inv_count = 1.0 / count
        mean = sum_ref[...] * inv_count
        var = jnp.maximum(sq_ref[...] * inv_count - mean * mean, 0.0)
        inv_std = jax.lax.rsqrt(var + eps)
        scale = gamma_ref[...] * inv_std                 # (C_out, 1) f32
        shift = beta_ref[...] - mean * scale

        def _apply(n, carry):
            out_ref[n] = out_ref[n] * scale + shift
            return carry

        jax.lax.fori_loop(0, out_ref.shape[0], _apply, 0)


def _conv_stats_kernel(x_ref, w_ref, mask_ref, y_ref, sum_ref, sq_ref,
                       *, B, KH, KW, W_pad, L):
    """Streaming pass 1: conv block (bf16 y intermediate) + BN partial stats."""
    patch = _build_patch(x_ref[0], KH=KH, KW=KW, W_pad=W_pad, width=B * L)
    y = jnp.dot(w_ref[...], patch, preferred_element_type=jnp.float32)
    for i in range(B):
        y_ref[i] = y[:, i * L:(i + 1) * L].astype(y_ref.dtype)
    ym = y * mask_ref[...]
    sum_ref[0] = jnp.sum(ym, axis=1, keepdims=True)
    sq_ref[0] = jnp.sum(ym * ym, axis=1, keepdims=True)


def _bn_apply_kernel(y_ref, scale_ref, shift_ref, o_ref):
    """Streaming pass 2: o = y * scale + shift (affine math in f32)."""
    o_ref[...] = y_ref[...].astype(jnp.float32) * scale_ref[...] + shift_ref[...]


def conv_norm2d(x, weight, bias, gamma, beta, *, stride=1, padding=1,
                dilation=1, groups=1, eps=1e-5,
                force_streaming=False, max_block_b=None):
    """x: (N, C_in, H, W) f32; weight: (C_out, C_in, KH, KW); gamma/beta: (C_out,).

    `bias` is accepted for module parity but unused: a per-channel constant
    cancels exactly under training-mode BatchNorm.
    """
    del bias
    assert stride == 1 and dilation == 1 and groups == 1, (
        "TODO(synk): only stride=1, dilation=1, groups=1, zero padding supported")
    N, C_in, H, W = x.shape
    C_out, C_in_w, KH, KW = weight.shape
    assert C_in_w == C_in
    H_pad, W_pad = H + 2 * padding, W + 2 * padding
    H_out, W_out = H_pad - KH + 1, W_pad - KW + 1
    HWp = H_pad * W_pad
    L = _round_up(HWp, 128)                 # lane-dense slab width per image
    C_in_p = _round_up(C_in, 8)             # sublane-aligned channel count
    K_p = KH * KW * C_in_p
    f32 = jnp.float32

    budget, vmem_limit = _vmem_budget()

    # per-image VMEM working set of one grid step: double-buffered bf16 x slab,
    # bf16 im2col patch temporary, f32 matmul result + pre-BN row traffic
    per_image = 2 * C_in_p * L * 2 + K_p * L * 2 + 3 * C_out * L * 4
    B = int(max(1, min(N, (budget // 3) // max(per_image, 1))))
    if max_block_b is not None:
        B = max(1, min(B, int(max_block_b)))
    N_pad = _round_up(N, B)
    n_blocks = N_pad // B
    BL = B * L

    # ---- plain-JAX layout glue: zero-pad, flatten lane-dense, im2col weight ----
    x_pad = jnp.pad(x, ((0, N_pad - N), (0, C_in_p - C_in),
                        (padding, padding), (padding, padding)))
    x_flat = jnp.pad(x_pad.reshape(N_pad, C_in_p, HWp),
                     ((0, 0), (0, 0), (0, L - HWp)))
    # lane-concatenate the B images of each block: (n_blocks, C_in_p, B*L) bf16
    x_blk = (x_flat.reshape(n_blocks, B, C_in_p, L)
             .transpose(0, 2, 1, 3)
             .reshape(n_blocks, C_in_p, BL)
             .astype(jnp.bfloat16))
    w_t = jnp.transpose(weight, (0, 2, 3, 1))                  # (C_out, KH, KW, C_in)
    w_t = jnp.pad(w_t, ((0, 0), (0, 0), (0, 0), (0, C_in_p - C_in)))
    w_k = w_t.reshape(C_out, K_p).astype(jnp.bfloat16)
    pos = jnp.arange(L, dtype=jnp.int32)
    mask = ((pos % W_pad < W_out) & (pos // W_pad < H_out)).astype(f32).reshape(1, L)
    mask_blk = jnp.tile(mask, (1, B))                          # (1, B*L)
    gamma_c = gamma.reshape(C_out, 1).astype(f32)
    beta_c = beta.reshape(C_out, 1).astype(f32)

    count = float(N * H_out * W_out)
    conv_flops = 2 * N_pad * H_out * W_out * C_out * KH * KW * C_in_p

    # resident pre-BN output + one pipelined step must fit the VMEM budget
    fused_bytes = (N_pad * C_out * L * 4 + B * per_image
                   + 2 * C_out * K_p * 2 + 2 * BL * 4)
    use_fused = (not force_streaming) and fused_bytes <= budget

    if use_fused:
        # ---- fused single pass: conv + in-VMEM BN, one HBM store of the result ----
        kernel = functools.partial(_fused_kernel, B=B, KH=KH, KW=KW,
                                   W_pad=W_pad, L=L, count=count, eps=float(eps))
        y_norm = pl.pallas_call(
            kernel,
            grid=(n_blocks,),
            in_specs=[
                pl.BlockSpec((1, C_in_p, BL), lambda b: (b, 0, 0)),
                pl.BlockSpec((C_out, K_p), lambda b: (0, 0)),
                pl.BlockSpec((1, BL), lambda b: (0, 0)),
                pl.BlockSpec((C_out, 1), lambda b: (0, 0)),
                pl.BlockSpec((C_out, 1), lambda b: (0, 0)),
            ],
            out_specs=pl.BlockSpec((N_pad, C_out, L), lambda b: (0, 0, 0)),
            out_shape=jax.ShapeDtypeStruct((N_pad, C_out, L), f32),
            scratch_shapes=[pltpu.VMEM((C_out, 1), f32),
                            pltpu.VMEM((C_out, 1), f32)],
            compiler_params=pltpu.CompilerParams(
                dimension_semantics=("arbitrary",),
                vmem_limit_bytes=vmem_limit),
            cost_estimate=pl.CostEstimate(
                flops=conv_flops + 4 * N_pad * C_out * L,
                transcendentals=0,
                bytes_accessed=int(N_pad * C_in_p * L * 2 + C_out * K_p * 2
                                   + BL * 4 + N_pad * C_out * L * 4)),
        )(x_blk, w_k, mask_blk, gamma_c, beta_c)
    else:
        # ---- streaming two-pass fallback (bf16 pre-BN intermediate in HBM) ----
        cparams = pltpu.CompilerParams(dimension_semantics=("parallel",),
                                       vmem_limit_bytes=vmem_limit)
        conv_kernel = functools.partial(_conv_stats_kernel, B=B, KH=KH, KW=KW,
                                        W_pad=W_pad, L=L)
        y, psum, psq = pl.pallas_call(
            conv_kernel,
            grid=(n_blocks,),
            in_specs=[
                pl.BlockSpec((1, C_in_p, BL), lambda b: (b, 0, 0)),
                pl.BlockSpec((C_out, K_p), lambda b: (0, 0)),
                pl.BlockSpec((1, BL), lambda b: (0, 0)),
            ],
            out_specs=(
                pl.BlockSpec((B, C_out, L), lambda b: (b, 0, 0)),
                pl.BlockSpec((1, C_out, 1), lambda b: (b, 0, 0)),
                pl.BlockSpec((1, C_out, 1), lambda b: (b, 0, 0)),
            ),
            out_shape=(
                jax.ShapeDtypeStruct((N_pad, C_out, L), jnp.bfloat16),
                jax.ShapeDtypeStruct((n_blocks, C_out, 1), f32),
                jax.ShapeDtypeStruct((n_blocks, C_out, 1), f32),
            ),
            compiler_params=cparams,
            cost_estimate=pl.CostEstimate(
                flops=conv_flops, transcendentals=0,
                bytes_accessed=int(N_pad * C_in_p * L * 2 + C_out * K_p * 2
                                   + BL * 4 + N_pad * C_out * L * 2
                                   + 2 * n_blocks * C_out * 4)),
        )(x_blk, w_k, mask_blk)

        # tiny f32 glue: global batch statistics -> per-channel scale/shift.
        # TODO(synk): E[y^2]-E[y]^2 can cancel for extreme activation scales; a
        # two-pass (y-mean)^2 variance over the stored y would be more robust.
        mean = jnp.sum(psum, axis=0) / count                   # (C_out, 1)
        var = jnp.maximum(jnp.sum(psq, axis=0) / count - mean * mean, 0.0)
        inv_std = jax.lax.rsqrt(var + eps)
        scale = gamma_c * inv_std
        shift = beta_c - mean * scale

        y_norm = pl.pallas_call(
            _bn_apply_kernel,
            grid=(n_blocks,),
            in_specs=[
                pl.BlockSpec((B, C_out, L), lambda b: (b, 0, 0)),
                pl.BlockSpec((C_out, 1), lambda b: (0, 0)),
                pl.BlockSpec((C_out, 1), lambda b: (0, 0)),
            ],
            out_specs=pl.BlockSpec((B, C_out, L), lambda b: (b, 0, 0)),
            out_shape=jax.ShapeDtypeStruct((N_pad, C_out, L), f32),
            compiler_params=cparams,
            cost_estimate=pl.CostEstimate(
                flops=2 * N_pad * C_out * L, transcendentals=0,
                bytes_accessed=int(N_pad * C_out * L * (2 + 4))),
        )(y, scale, shift)

    # crop the conv halo / lane / batch padding and restore NCHW
    out = (y_norm[:N, :, :HWp]
           .reshape(N, C_out, H_pad, W_pad)[:, :, :H_out, :W_out])
    return out


def _reference(x, weight, bias, gamma, beta, padding, eps):
    # Reference uses the same bf16-rounded conv operands as the kernel's MXU
    # path (f32 accumulation), so the comparison isolates kernel correctness.
    xq = x.astype(jnp.bfloat16).astype(jnp.float32)
    wq = weight.astype(jnp.bfloat16).astype(jnp.float32)
    y = jax.lax.conv_general_dilated(
        xq, wq, window_strides=(1, 1),
        padding=[(padding, padding), (padding, padding)],
        dimension_numbers=("NCHW", "OIHW", "NCHW"),
    ) + bias[None, :, None, None]
    mean = y.mean(axis=(0, 2, 3), keepdims=True)
    var = y.var(axis=(0, 2, 3), keepdims=True)     # biased -> BN training mode
    y_hat = (y - mean) * jax.lax.rsqrt(var + eps)
    return y_hat * gamma[None, :, None, None] + beta[None, :, None, None]


if __name__ == "__main__":
    key = jax.random.PRNGKey(0)
    k_x, k_w, k_b, k_g, k_be = jax.random.split(key, 5)

    # ConvNorm2d(in_channels=4, out_channels=8, kernel_size=3, padding=1)
    N, C_in, H, W = 2, 4, 16, 16
    C_out, KH, KW = 8, 3, 3
    padding, eps = 1, 1e-5

    x = jax.random.normal(k_x, (N, C_in, H, W), jnp.float32)
    weight = jax.random.normal(k_w, (C_out, C_in, KH, KW), jnp.float32) * 0.1
    bias = jax.random.normal(k_b, (C_out,), jnp.float32) * 0.1
    gamma = 1.0 + 0.1 * jax.random.normal(k_g, (C_out,), jnp.float32)
    beta = 0.1 * jax.random.normal(k_be, (C_out,), jnp.float32)

    ref = _reference(x, weight, bias, gamma, beta, padding, eps)

    # fused single-pass path (whole pre-BN intermediate resident in VMEM)
    out = jax.block_until_ready(
        conv_norm2d(x, weight, bias, gamma, beta, padding=padding, eps=eps))
    assert out.shape == (N, C_out, H, W), out.shape
    err = float(jnp.max(jnp.abs(out - ref)))
    assert jnp.allclose(out, ref, atol=2e-3, rtol=2e-3), err

    # fused path with >1 grid step (exercises cross-step stats accumulation
    # and the resident-output accumulator pattern)
    out_mb = jax.block_until_ready(
        conv_norm2d(x, weight, bias, gamma, beta, padding=padding, eps=eps,
                    max_block_b=1))
    err_mb = float(jnp.max(jnp.abs(out_mb - ref)))
    assert jnp.allclose(out_mb, ref, atol=2e-3, rtol=2e-3), err_mb

    # streaming two-pass fallback (bf16 pre-BN intermediate, looser tolerance)
    out_st = jax.block_until_ready(
        conv_norm2d(x, weight, bias, gamma, beta, padding=padding, eps=eps,
                    force_streaming=True))
    err_st = float(jnp.max(jnp.abs(out_st - ref)))
    assert jnp.allclose(out_st, ref, atol=3e-2, rtol=3e-2), err_st

    print("KERNEL_OK")
</pallas_src>

<mosaic_0001>
module attributes {stable_mosaic.version = 11 : i64} {
  func.func @_fused_kernel(%arg0: i32, %arg1: memref<1x8x768xbf16, #tpu.memory_space<vmem>>, %arg2: memref<8x72xbf16, #tpu.memory_space<vmem>>, %arg3: memref<1x768xf32, #tpu.memory_space<vmem>>, %arg4: memref<8x1xf32, #tpu.memory_space<vmem>>, %arg5: memref<8x1xf32, #tpu.memory_space<vmem>>, %arg6: memref<2x8x384xf32, #tpu.memory_space<vmem>>, %arg7: memref<8x1xf32, #tpu.memory_space<vmem>>, %arg8: memref<8x1xf32, #tpu.memory_space<vmem>>) attributes {dimension_semantics = [#tpu.dimension_semantics<arbitrary>], iteration_bounds = array<i64: 1>, scalar_prefetch = 0 : i64, scratch_operands = 2 : i64, tpu.core_type = #tpu.core_type<tc>, window_params = [{transform_indices = @transform_0, window_bounds = array<i64: 1, 8, 768>}, {pipeline_mode = #tpu.pipeline_mode<synchronous>, transform_indices = @transform_1, window_bounds = array<i64: 8, 72>}, {pipeline_mode = #tpu.pipeline_mode<synchronous>, transform_indices = @transform_2, window_bounds = array<i64: 1, 768>}, {pipeline_mode = #tpu.pipeline_mode<synchronous>, transform_indices = @transform_3, window_bounds = array<i64: 8, 1>}, {pipeline_mode = #tpu.pipeline_mode<synchronous>, transform_indices = @transform_4, window_bounds = array<i64: 8, 1>}, {pipeline_mode = #tpu.pipeline_mode<synchronous>, transform_indices = @transform_5, window_bounds = array<i64: 2, 8, 384>}]} {
    %c0_i32 = arith.constant 0 : i32
    %0 = arith.cmpi eq, %arg0, %c0_i32 : i32
    %1 = arith.extui %0 : i1 to i32
    %c0_i32_0 = arith.constant 0 : i32
    %2 = arith.cmpi ne, %1, %c0_i32_0 : i32
    scf.if %2 {
      %cst_25 = arith.constant 0.000000e+00 : f32
      %56 = vector.broadcast %cst_25 : f32 to vector<8x1xf32>
      %c0_26 = arith.constant 0 : index
      %c0_27 = arith.constant 0 : index
      %57 = vector.load %arg7[%c0_26, %c0_27] : memref<8x1xf32, #tpu.memory_space<vmem>>, vector<8x1xf32>
      tpu.vector_store %arg7[%c0_26, %c0_27], %56 {strides = array<i32>} : memref<8x1xf32, #tpu.memory_space<vmem>>, vector<8x1xf32>,
      %cst_28 = arith.constant 0.000000e+00 : f32
      %58 = vector.broadcast %cst_28 : f32 to vector<8x1xf32>
      %c0_29 = arith.constant 0 : index
      %c0_30 = arith.constant 0 : index
      %59 = vector.load %arg8[%c0_29, %c0_30] : memref<8x1xf32, #tpu.memory_space<vmem>>, vector<8x1xf32>
      tpu.vector_store %arg8[%c0_29, %c0_30], %58 {strides = array<i32>} : memref<8x1xf32, #tpu.memory_space<vmem>>, vector<8x1xf32>,
    } else {
    }
    %c0 = arith.constant 0 : index
    %c0_1 = arith.constant 0 : index
    %c0_2 = arith.constant 0 : index
    %3 = vector.load %arg1[%c0, %c0_1, %c0_2] : memref<1x8x768xbf16, #tpu.memory_space<vmem>>, vector<1x8x768xbf16>
    %4 = vector.shape_cast %3 : vector<1x8x768xbf16> to vector<8x768xbf16>
    %5 = tpu.bitcast %4 : vector<8x768xbf16> -> vector<4x768xi32>
    %c767_i32 = arith.constant 767 : i32
    %6 = tpu.dynamic_rotate %5 by %c767_i32 dim 1 : vector<4x768xi32>, i32 -> vector<4x768xi32>
    %7 = tpu.bitcast %6 : vector<4x768xi32> -> vector<8x768xbf16>
    %c766_i32 = arith.constant 766 : i32
    %8 = tpu.dynamic_rotate %5 by %c766_i32 dim 1 : vector<4x768xi32>, i32 -> vector<4x768xi32>
    %9 = tpu.bitcast %8 : vector<4x768xi32> -> vector<8x768xbf16>
    %c750_i32 = arith.constant 750 : i32
    %10 = tpu.dynamic_rotate %5 by %c750_i32 dim 1 : vector<4x768xi32>, i32 -> vector<4x768xi32>
    %11 = tpu.bitcast %10 : vector<4x768xi32> -> vector<8x768xbf16>
    %c749_i32 = arith.constant 749 : i32
    %12 = tpu.dynamic_rotate %5 by %c749_i32 dim 1 : vector<4x768xi32>, i32 -> vector<4x768xi32>
    %13 = tpu.bitcast %12 : vector<4x768xi32> -> vector<8x768xbf16>
    %c748_i32 = arith.constant 748 : i32
    %14 = tpu.dynamic_rotate %5 by %c748_i32 dim 1 : vector<4x768xi32>, i32 -> vector<4x768xi32>
    %15 = tpu.bitcast %14 : vector<4x768xi32> -> vector<8x768xbf16>
    %c732_i32 = arith.constant 732 : i32
    %16 = tpu.dynamic_rotate %5 by %c732_i32 dim 1 : vector<4x768xi32>, i32 -> vector<4x768xi32>
    %17 = tpu.bitcast %16 : vector<4x768xi32> -> vector<8x768xbf16>
    %c731_i32 = arith.constant 731 : i32
    %18 = tpu.dynamic_rotate %5 by %c731_i32 dim 1 : vector<4x768xi32>, i32 -> vector<4x768xi32>
    %19 = tpu.bitcast %18 : vector<4x768xi32> -> vector<8x768xbf16>
    %c730_i32 = arith.constant 730 : i32
    %20 = tpu.dynamic_rotate %5 by %c730_i32 dim 1 : vector<4x768xi32>, i32 -> vector<4x768xi32>
    %21 = tpu.bitcast %20 : vector<4x768xi32> -> vector<8x768xbf16>
    %22 = tpu.concatenate %4, %7, %9, %11, %13, %15, %17, %19, %21 in 0 : vector<8x768xbf16>, vector<8x768xbf16>, vector<8x768xbf16>, vector<8x768xbf16>, vector<8x768xbf16>, vector<8x768xbf16>, vector<8x768xbf16>, vector<8x768xbf16>, vector<8x768xbf16> -> vector<72x768xbf16>
    %c0_3 = arith.constant 0 : index
    %c0_4 = arith.constant 0 : index
    %23 = vector.load %arg2[%c0_3, %c0_4] : memref<8x72xbf16, #tpu.memory_space<vmem>>, vector<8x72xbf16>
    %cst = arith.constant dense<0.000000e+00> : vector<8x768xf32>
    %24 = tpu.matmul %23, %22, %cst {dimension_numbers = #tpu.dot_dimension_numbers<[1], [0], [0], [1], [0, 0, 1, 1], [], []>} : vector<8x72xbf16>, vector<72x768xbf16>, vector<8x768xf32> -> vector<8x768xf32>
    %25 = vector.extract_strided_slice %24 {offsets = [0, 0], sizes = [8, 384], strides = [1, 1]} : vector<8x768xf32> to vector<8x384xf32>
    %c2_i32 = arith.constant 2 : i32
    %26 = arith.muli %arg0, %c2_i32 : i32
    %c0_i32_5 = arith.constant 0 : i32
    %27 = arith.addi %26, %c0_i32_5 : i32
    %28 = arith.index_cast %27 : i32 to index
    %c0_6 = arith.constant 0 : index
    %c0_7 = arith.constant 0 : index
    %29 = vector.load %arg6[%28, %c0_6, %c0_7] : memref<2x8x384xf32, #tpu.memory_space<vmem>>, vector<1x8x384xf32>
    %30 = vector.shape_cast %29 : vector<1x8x384xf32> to vector<8x384xf32>
    %31 = vector.shape_cast %25 : vector<8x384xf32> to vector<1x8x384xf32>
    tpu.vector_store %arg6[%28, %c0_6, %c0_7], %31 {strides = array<i32>} : memref<2x8x384xf32, #tpu.memory_space<vmem>>, vector<1x8x384xf32>,
    %32 = vector.extract_strided_slice %24 {offsets = [0, 384], sizes = [8, 384], strides = [1, 1]} : vector<8x768xf32> to vector<8x384xf32>
    %c2_i32_8 = arith.constant 2 : i32
    %33 = arith.muli %arg0, %c2_i32_8 : i32
    %c1_i32 = arith.constant 1 : i32
    %34 = arith.addi %33, %c1_i32 : i32
    %35 = arith.index_cast %34 : i32 to index
    %c0_9 = arith.constant 0 : index
    %c0_10 = arith.constant 0 : index
    %36 = vector.load %arg6[%35, %c0_9, %c0_10] : memref<2x8x384xf32, #tpu.memory_space<vmem>>, vector<1x8x384xf32>
    %37 = vector.shape_cast %36 : vector<1x8x384xf32> to vector<8x384xf32>
    %38 = vector.shape_cast %32 : vector<8x384xf32> to vector<1x8x384xf32>
    tpu.vector_store %arg6[%35, %c0_9, %c0_10], %38 {strides = array<i32>} : memref<2x8x384xf32, #tpu.memory_space<vmem>>, vector<1x8x384xf32>,
    %c0_11 = arith.constant 0 : index
    %c0_12 = arith.constant 0 : index
    %39 = vector.load %arg3[%c0_11, %c0_12] : memref<1x768xf32, #tpu.memory_space<vmem>>, vector<1x768xf32>
    %40 = vector.broadcast %39 : vector<1x768xf32> to vector<8x768xf32>
    %41 = arith.mulf %24, %40 : vector<8x768xf32>
    %c0_13 = arith.constant 0 : index
    %c0_14 = arith.constant 0 : index
    %42 = vector.load %arg7[%c0_13, %c0_14] : memref<8x1xf32, #tpu.memory_space<vmem>>, vector<8x1xf32>
    %cst_15 = arith.constant dense<0.000000e+00> : vector<8xf32>
    %43 = vector.multi_reduction <add>, %41, %cst_15 [1] : vector<8x768xf32> to vector<8xf32>
    %44 = vector.shape_cast %43 : vector<8xf32> to vector<8x1xf32>
    %45 = arith.addf %42, %44 : vector<8x1xf32>
    %c0_16 = arith.constant 0 : index
    %c0_17 = arith.constant 0 : index
    %46 = vector.load %arg7[%c0_16, %c0_17] : memref<8x1xf32, #tpu.memory_space<vmem>>, vector<8x1xf32>
    tpu.vector_store %arg7[%c0_16, %c0_17], %45 {strides = array<i32>} : memref<8x1xf32, #tpu.memory_space<vmem>>, vector<8x1xf32>,
    %c0_18 = arith.constant 0 : index
    %c0_19 = arith.constant 0 : index
    %47 = vector.load %arg8[%c0_18, %c0_19] : memref<8x1xf32, #tpu.memory_space<vmem>>, vector<8x1xf32>
    %48 = arith.mulf %41, %41 : vector<8x768xf32>
    %cst_20 = arith.constant dense<0.000000e+00> : vector<8xf32>
    %49 = vector.multi_reduction <add>, %48, %cst_20 [1] : vector<8x768xf32> to vector<8xf32>
    %50 = vector.shape_cast %49 : vector<8xf32> to vector<8x1xf32>
    %51 = arith.addf %47, %50 : vector<8x1xf32>
    %c0_21 = arith.constant 0 : index
    %c0_22 = arith.constant 0 : index
    %52 = vector.load %arg8[%c0_21, %c0_22] : memref<8x1xf32, #tpu.memory_space<vmem>>, vector<8x1xf32>
    tpu.vector_store %arg8[%c0_21, %c0_22], %51 {strides = array<i32>} : memref<8x1xf32, #tpu.memory_space<vmem>>, vector<8x1xf32>,
    %c0_i32_23 = arith.constant 0 : i32
    %53 = arith.cmpi eq, %arg0, %c0_i32_23 : i32
    %54 = arith.extui %53 : i1 to i32
    %c0_i32_24 = arith.constant 0 : i32
    %55 = arith.cmpi ne, %54, %c0_i32_24 : i32
    scf.if %55 {
      %c0_25 = arith.constant 0 : index
      %c0_26 = arith.constant 0 : index
      %56 = vector.load %arg7[%c0_25, %c0_26] : memref<8x1xf32, #tpu.memory_space<vmem>>, vector<8x1xf32>
      %cst_27 = arith.constant 0.001953125 : f32
      %57 = vector.broadcast %cst_27 : f32 to vector<8x1xf32>
      %58 = arith.mulf %56, %57 : vector<8x1xf32>
      %c0_28 = arith.constant 0 : index
      %c0_29 = arith.constant 0 : index
      %59 = vector.load %arg8[%c0_28, %c0_29] : memref<8x1xf32, #tpu.memory_space<vmem>>, vector<8x1xf32>
      %cst_30 = arith.constant 0.001953125 : f32
      %60 = vector.broadcast %cst_30 : f32 to vector<8x1xf32>
      %61 = arith.mulf %59, %60 : vector<8x1xf32>
      %62 = arith.mulf %58, %58 : vector<8x1xf32>
      %63 = arith.subf %61, %62 : vector<8x1xf32>
      %cst_31 = arith.constant 0.000000e+00 : f32
      %64 = vector.broadcast %cst_31 : f32 to vector<8x1xf32>
      %65 = arith.maximumf %63, %64 : vector<8x1xf32>
      %cst_32 = arith.constant 9.99999974E-6 : f32
      %66 = vector.broadcast %cst_32 : f32 to vector<8x1xf32>
      %67 = arith.addf %65, %66 : vector<8x1xf32>
      %68 = math.rsqrt %67 : vector<8x1xf32>
      %c0_33 = arith.constant 0 : index
      %c0_34 = arith.constant 0 : index
      %69 = vector.load %arg4[%c0_33, %c0_34] : memref<8x1xf32, #tpu.memory_space<vmem>>, vector<8x1xf32>
      %70 = arith.mulf %69, %68 : vector<8x1xf32>
      %c0_35 = arith.constant 0 : index
      %c0_36 = arith.constant 0 : index
      %71 = vector.load %arg5[%c0_35, %c0_36] : memref<8x1xf32, #tpu.memory_space<vmem>>, vector<8x1xf32>
      %72 = arith.mulf %58, %70 : vector<8x1xf32>
      %73 = arith.subf %71, %72 : vector<8x1xf32>
      %c0_i32_37 = arith.constant 0 : i32
      %c2_i32_38 = arith.constant 2 : i32
      %74 = arith.addi %c0_i32_37, %c2_i32_38 : i32
      %c1_i32_39 = arith.constant 1 : i32
      scf.for %arg9 = %c0_i32_37 to %74 step %c1_i32_39  : i32 {
        %75 = arith.index_cast %arg9 : i32 to index
        %c0_41 = arith.constant 0 : index
        %c0_42 = arith.constant 0 : index
        %76 = vector.load %arg6[%75, %c0_41, %c0_42] : memref<2x8x384xf32, #tpu.memory_space<vmem>>, vector<1x8x384xf32>
        %77 = vector.shape_cast %76 : vector<1x8x384xf32> to vector<8x384xf32>
        %78 = vector.broadcast %70 : vector<8x1xf32> to vector<8x384xf32>
        %79 = arith.mulf %77, %78 : vector<8x384xf32>
        %80 = vector.broadcast %73 : vector<8x1xf32> to vector<8x384xf32>
        %81 = arith.addf %79, %80 : vector<8x384xf32>
        %82 = arith.index_cast %arg9 : i32 to index
        %c0_43 = arith.constant 0 : index
        %c0_44 = arith.constant 0 : index
        %83 = vector.load %arg6[%82, %c0_43, %c0_44] : memref<2x8x384xf32, #tpu.memory_space<vmem>>, vector<1x8x384xf32>
        %84 = vector.shape_cast %83 : vector<1x8x384xf32> to vector<8x384xf32>
        %85 = vector.shape_cast %81 : vector<8x384xf32> to vector<1x8x384xf32>
        tpu.vector_store %arg6[%82, %c0_43, %c0_44], %85 {strides = array<i32>} : memref<2x8x384xf32, #tpu.memory_space<vmem>>, vector<1x8x384xf32>,
      }
      %c2_i32_40 = arith.constant 2 : i32
    } else {
    }
    return
  }
  func.func @transform_0(%arg0: i32) -> (i32, i32, i32) {
    %c0_i32 = arith.constant 0 : i32
    %c0_i32_0 = arith.constant 0 : i32
    %c0_i32_1 = arith.constant 0 : i32
    return %arg0, %c0_i32, %c0_i32_0 : i32, i32, i32
  }
  func.func @transform_1(%arg0: i32) -> (i32, i32) {
    %c0_i32 = arith.constant 0 : i32
    %c0_i32_0 = arith.constant 0 : i32
    %c0_i32_1 = arith.constant 0 : i32
    return %c0_i32, %c0_i32_0 : i32, i32
  }
  func.func @transform_2(%arg0: i32) -> (i32, i32) {
    %c0_i32 = arith.constant 0 : i32
    %c0_i32_0 = arith.constant 0 : i32
    %c0_i32_1 = arith.constant 0 : i32
    return %c0_i32, %c0_i32_0 : i32, i32
  }
  func.func @transform_3(%arg0: i32) -> (i32, i32) {
    %c0_i32 = arith.constant 0 : i32
    %c0_i32_0 = arith.constant 0 : i32
    %c0_i32_1 = arith.constant 0 : i32
    return %c0_i32, %c0_i32_0 : i32, i32
  }
  func.func @transform_4(%arg0: i32) -> (i32, i32) {
    %c0_i32 = arith.constant 0 : i32
    %c0_i32_0 = arith.constant 0 : i32
    %c0_i32_1 = arith.constant 0 : i32
    return %c0_i32, %c0_i32_0 : i32, i32
  }
  func.func @transform_5(%arg0: i32) -> (i32, i32, i32) {
    %c0_i32 = arith.constant 0 : i32
    %c0_i32_0 = arith.constant 0 : i32
    %c0_i32_1 = arith.constant 0 : i32
    %c0_i32_2 = arith.constant 0 : i32
    return %c0_i32, %c0_i32_0, %c0_i32_1 : i32, i32, i32
  }
}

</mosaic_0001>

<bundles_post_ra>
// kernel: tpu_custom_call.1
= control target key start
LH: loop header
LB: loop body
LE: loop exit
PB: predicated region body
PF: predicated region fallthrough
CT: control target
= control target key end

     0   :  { %10 = vsyncpa [#allocation5], 0  ;;  %s1053_s0 = inlined_call_operand.hbm [shape: bf16[1,8,768], index: 0, kind: input, shape index: {}]   ;;  %s1054_s1 = inlined_call_operand.vmem [shape: bf16[8,72], index: 1, kind: input, shape index: {}]   ;;  %s1055_s2 = inlined_call_operand.vmem [shape: f32[1,768], index: 2, kind: input, shape index: {}]   ;;  %s1056_s3 = inlined_call_operand.vmem [shape: f32[8,1], index: 3, kind: input, shape index: {}]   ;;  %s1057_s4 = inlined_call_operand.vmem [shape: f32[8,1], index: 4, kind: input, shape index: {}]   ;;  %s1058_s5 = inlined_call_operand.hbm [shape: f32[2,8,384], index: 5, kind: output, shape index: {}]  }
   0x1   :  { %11 = vsyncpa [#allocation6], 0  ;;  %s17_s20 = sshll.u32 %s1053_s0, 4  ;;  %s675_s21 = smov [#allocation4]   ;;  %s18_s20 = int_to_ptr.hbm [resolvable:$true] %s17_s20 }
   0x2   :  { %s19_s22 = sshll.u32 %s675_s21, 4  ;;  %s20_s22 = int_to_ptr.vmem [resolvable:$true] %s19_s22 }
   0x3   :  { %22 = dma.hbm_to_vmem [thread:$0]  %s18_s20, 384, %s20_s22, [#allocation5]  }
   0x4   :  { %667 = dma.done.wait [#allocation5], 384  }
   0x5   :  { %668 = vsyncadd [#allocation5], 4294966912  ;;  %v44_v0 = vld [vmem:[#allocation4 + $0x8] sm:$0xff]  ;;  %v43_v1 = vld [vmem:[#allocation4] sm:$0xff]  ;;  %s676_s23 = smov 90   ;;  %s677_s0 = smov 91   ;;  %v79_v17 = vlaneseq }
   0x6   :  { %v51_v2 = vunpack.c.l.b16 %v44_v0  ;;  %v49_v3 = vunpack.c.l.b16 %v43_v1  ;;  %v50_v6 = vunpack.c.h.b16 %v43_v1  ;;  %s678_s24 = smov 92   ;;  %s679_s25 = smov 108   ;;  %v52_v8 = vunpack.c.h.b16 %v44_v0  ;;  %v45_v10 = vld [vmem:[#allocation4 + $0x10] sm:$0xff] }
   0x7   :  { %s680_s26 = smov 109   ;;  %v53_v11 = vunpack.c.l.b16 %v45_v10  ;;  %s681_s27 = smov 110   ;;  %v54_v13 = vunpack.c.h.b16 %v45_v10  ;;  %v822_v19 = vand.u32 127, %v79_v17  ;;  %vm269_vm1 = vcmask 1043456  }
   0x8   :  { %v722_v4 = vpack.c.b16 %v51_v2, %v51_v2  ;;  %v724_v5 = vpack.c.b16 %v49_v3, %v49_v3  ;;  %v732_v7 = vpack.c.b16 %v50_v6, %v50_v6  ;;  %v746_v9 = vpack.c.b16 %v52_v8, %v52_v8  ;;  %s682_s28 = smov 126   ;;  %s683_s29 = smov 127  }
   0x9   :  { %v760_v12 = vpack.c.b16 %v53_v11, %v53_v11  ;;  %v798_v14 = vpack.c.b16 %v54_v13, %v54_v13  ;;  %vm214_vm0 = vcmp.lt.s32.totalorder %v822_v19, 90  ;;  %vm195_vm2 = vcmp.lt.s32.totalorder %v822_v19, 91  ;;  %s671_s11 = smov 0  }
   0xa   :  { %206 = vrot.lane.b32.xlu2 %v722_v4, %s676_s23  ;;  %183 = vrot.lane.b32.xlu1 %v724_v5, %s677_s0  ;;  %vm176_vm3 = vcmp.lt.s32.totalorder %v822_v19, 92  ;;  %vm157_vm4 = vcmp.lt.s32.totalorder %v822_v19, 108  ;;  %vm138_vm5 = vcmp.lt.s32.totalorder %v822_v19, 109  ;;  %vm119_vm6 = vcmp.lt.s32.totalorder %v822_v19, 110 }
   0xb   :  { %202 = vrot.lane.b32.xlu0 %v724_v5, %s676_s23  ;;  %vm100_vm7 = vcmp.lt.s32.totalorder %v822_v19, 126  ;;  %vm81_vm8 = vcmp.lt.s32.totalorder %v822_v19, 127  ;;  %vm343_vm9 = vcmask 588800   ;;  %vm40_vm10 = vcmask 7168  }
  0x12   :  { %164 = vrot.lane.b32.xlu2 %v724_v5, %s678_s24  ;;  %185 = vrot.lane.b32.xlu1 %v732_v7, %s677_s0 }
  0x13   :  { %204 = vrot.lane.b32.xlu0 %v732_v7, %s676_s23 }
  0x1a   :  { %145 = vrot.lane.b32.xlu2 %v724_v5, %s679_s25  ;;  %187 = vrot.lane.b32.xlu1 %v722_v4, %s677_s0 }
  0x1b   :  { %166 = vrot.lane.b32.xlu0 %v732_v7, %s678_s24 }
  0x22   :  { %208 = vrot.lane.b32.xlu2 %v746_v9, %s676_s23  ;;  %168 = vrot.lane.b32.xlu1 %v722_v4, %s678_s24 }
  0x23   :  { %147 = vrot.lane.b32.xlu0 %v732_v7, %s679_s25 }
  0x2a   :  { %149 = vrot.lane.b32.xlu2 %v722_v4, %s679_s25  ;;  %128 = vrot.lane.b32.xlu1 %v732_v7, %s680_s26 }
  0x2b   :  { %126 = vrot.lane.b32.xlu0 %v724_v5, %s680_s26 }
  0x32   :  { %107 = vrot.lane.b32.xlu2 %v724_v5, %s681_s27  ;;  %210 = vrot.lane.b32.xlu1 %v760_v12, %s676_s23 }
  0x33   :  { %189 = vrot.lane.b32.xlu0 %v746_v9, %s677_s0 }
  0x3a   :  { %170 = vrot.lane.b32.xlu2 %v746_v9, %s678_s24  ;;  %130 = vrot.lane.b32.xlu1 %v722_v4, %s680_s26 }
  0x3b   :  { %109 = vrot.lane.b32.xlu0 %v732_v7, %s681_s27 }
  0x42   :  { %90 = vrot.lane.b32.xlu2 %v732_v7, %s682_s28  ;;  %88 = vrot.lane.b32.xlu1 %v724_v5, %s682_s28 }
  0x43   :  { %191 = vrot.lane.b32.xlu0 %v760_v12, %s677_s0 }
  0x4a   :  { %172 = vrot.lane.b32.xlu2 %v760_v12, %s678_s24  ;;  %151 = vrot.lane.b32.xlu1 %v746_v9, %s679_s25 }
  0x4b   :  { %111 = vrot.lane.b32.xlu0 %v722_v4, %s681_s27 }
  0x52   :  { %92 = vrot.lane.b32.xlu2 %v722_v4, %s682_s28  ;;  %69 = vrot.lane.b32.xlu1 %v732_v7, %s683_s29 }
  0x53   :  { %67 = vrot.lane.b32.xlu0 %v724_v5, %s683_s29 }
  0x5a   :  { %71 = vrot.lane.b32.xlu2 %v722_v4, %s683_s29  ;;  %153 = vrot.lane.b32.xlu1 %v760_v12, %s679_s25 }
  0x5b   :  { %132 = vrot.lane.b32.xlu0 %v746_v9, %s680_s26 }
  0x62   :  { %212 = vrot.lane.b32.xlu2 %v798_v14, %s676_s23  ;;  %134 = vrot.lane.b32.xlu1 %v760_v12, %s680_s26 }
  0x63   :  { %113 = vrot.lane.b32.xlu0 %v746_v9, %s681_s27 }
  0x64   :  { %v207_v15 = vpop.permute.xlu2 %206 }
  0x6a   :  { %193 = vrot.lane.b32.xlu2 %v798_v14, %s677_s0  ;;  %115 = vrot.lane.b32.xlu1 %v760_v12, %s681_s27 }
  0x6b   :  { %94 = vrot.lane.b32.xlu0 %v746_v9, %s682_s28 }
  0x6c   :  { %v812_v16 = vpop.permute.xlu2 %164 }
  0x72   :  { %174 = vrot.lane.b32.xlu2 %v798_v14, %s678_s24  ;;  %96 = vrot.lane.b32.xlu1 %v760_v12, %s682_s28 }
  0x73   :  { %73 = vrot.lane.b32.xlu0 %v746_v9, %s683_s29 }
  0x74   :  { %v820_v18 = vpop.permute.xlu2 %145 }
  0x7a   :  { %136 = vrot.lane.b32.xlu2 %v798_v14, %s680_s26  ;;  %155 = vrot.lane.b32.xlu1 %v798_v14, %s679_s25 }
  0x7b   :  { %75 = vrot.lane.b32.xlu0 %v760_v12, %s683_s29 }
  0x7c   :  { %v209_v20 = vpop.permute.xlu2 %208  ;;  %v831_v21 = vpop.permute.xlu1 %183 }
  0x7d   :  { %v833_v22 = vpop.permute.xlu0 %202  ;;  %v217_v23 = vsel %vm214_vm0, %v207_v15, %v209_v20 }
  0x7e   :  { %v351_v24 = vsel %vm269_vm1, %v217_v23, 0 }
  0x7f   :  { %388 = vmatpush.bf16.msra.mxu2 %v351_v24 }
  0x82   :  { %77 = vrot.lane.b32.xlu2 %v798_v14, %s683_s29  ;;  %98 = vrot.lane.b32.xlu1 %v798_v14, %s682_s28 }
  0x83   :  { %117 = vrot.lane.b32.xlu0 %v798_v14, %s681_s27 }
  0x84   :  { %v844_v25 = vpop.permute.xlu2 %149  ;;  %v186_v26 = vpop.permute.xlu1 %185 }
  0x85   :  { %v205_v27 = vpop.permute.xlu0 %204  ;;  %v200_v32 = vsel %vm195_vm2, %v831_v21, %v186_v26 }
  0x86   :  { %v219_v28 = vsel %vm214_vm0, %v833_v22, %v205_v27  ;;  %v218_v29 = vsel %vm214_vm0, %v205_v27, %v207_v15  ;;  %v263_v35 = vrot.slane %v200_v32, 4 }
  0x87   :  { %v347_v30 = vsel %vm269_vm1, %v219_v28, 0  ;;  %v349_v31 = vsel %vm269_vm1, %v218_v29, 0 }
  0x88   :  { %362 = vmatpush.bf16.msra.mxu0 %v347_v30  ;;  %375 = vmatpush.bf16.msra.mxu1 %v349_v31 }
  0x8c   :  { %v858_v33 = vpop.permute.xlu2 %107  ;;  %v188_v34 = vpop.permute.xlu1 %187 }
  0x8d   :  { %v167_v36 = vpop.permute.xlu0 %166  ;;  %v199_v39 = vsel %vm195_vm2, %v186_v26, %v188_v34 }
  0x8e   :  { %v181_v37 = vsel %vm176_vm3, %v812_v16, %v167_v36  ;;  %v264_v40 = vrot.slane %v199_v39, 4 }
  0x8f   :  { %v325_v38 = vsel %vm269_vm1, %v181_v37, %v263_v35 }
  0x90   :  { %363 = vmatpush.bf16.msra.mxu0 %v325_v38 }
  0x94   :  { %v171_v41 = vpop.permute.xlu2 %170  ;;  %v169_v42 = vpop.permute.xlu1 %168 }
  0x95   :  { %v180_v43 = vsel %vm176_vm3, %v167_v36, %v169_v42  ;;  %v148_v44 = vpop.permute.xlu0 %147  ;;  %v179_v60 = vsel %vm176_vm3, %v169_v42, %v171_v41 }
  0x96   :  { %v328_v45 = vsel %vm269_vm1, %v180_v43, %v264_v40  ;;  %v162_v46 = vsel %vm157_vm4, %v820_v18, %v148_v44  ;;  %v161_v61 = vsel %vm157_vm4, %v148_v44, %v844_v25 }
  0x97   :  { %376 = vmatpush.bf16.msra.mxu1 %v328_v45  ;;  %v251_v49 = vrot.slane %v162_v46, 4  ;;  %v252_v63 = vrot.slane %v161_v61, 4 }
  0x9c   :  { %v91_v47 = vpop.permute.xlu2 %90  ;;  %v129_v48 = vpop.permute.xlu1 %128 }
  0x9d   :  { %v874_v50 = vpop.permute.xlu0 %126 }
  0x9e   :  { %v143_v51 = vsel %vm138_vm5, %v874_v50, %v129_v48 }
  0x9f   :  { %v307_v52 = vsel %vm269_vm1, %v143_v51, %v251_v49  ;;  %v954_v51 = vld [vmem:[%s1054_s1] sm:$0xf] }
  0xa0   :  { %364 = vmatpush.bf16.msra.mxu0 %v307_v52 }
  0xa4   :  { %v880_v53 = vpop.permute.xlu2 %172  ;;  %v211_v54 = vpop.permute.xlu1 %210 }
  0xa5   :  { %v190_v55 = vpop.permute.xlu0 %189  ;;  %v216_v56 = vsel %vm214_vm0, %v209_v20, %v211_v54  ;;  %v178_v26 = vsel %vm176_vm3, %v171_v41, %v880_v53 }
  0xa6   :  { %v198_v57 = vsel %vm195_vm2, %v188_v34, %v190_v55  ;;  %v353_v58 = vsel %vm269_vm1, %v216_v56, 0 }
  0xa7   :  { %v265_v59 = vrot.slane %v198_v57, 4  ;;  %401 = vmatpush.bf16.msra.mxu3 %v353_v58 }
  0xa9   :  { %v331_v62 = vsel %vm269_vm1, %v179_v60, %v265_v59 }
  0xaa   :  { %389 = vmatpush.bf16.msra.mxu2 %v331_v62 }
  0xac   :  { %v893_v0 = vpop.permute.xlu2 %92  ;;  %v131_v1 = vpop.permute.xlu1 %130 }
  0xad   :  { %v142_v2 = vsel %vm138_vm5, %v129_v48, %v131_v1  ;;  %v110_v3 = vpop.permute.xlu0 %109  ;;  %v104_v35 = vsel %vm100_vm7, %v91_v47, %v893_v0 }
  0xae   :  { %v310_v6 = vsel %vm269_vm1, %v142_v2, %v252_v63  ;;  %v124_v8 = vsel %vm119_vm6, %v858_v33, %v110_v3 }
  0xaf   :  { %377 = vmatpush.bf16.msra.mxu1 %v310_v6  ;;  %v239_v10 = vrot.slane %v124_v8, 4 }
  0xb4   :  { %v903_v11 = vpop.permute.xlu2 %71  ;;  %v905_v13 = vpop.permute.xlu1 %88 }
  0xb5   :  { %v105_v15 = vsel %vm100_vm7, %v905_v13, %v91_v47  ;;  %v192_v17 = vpop.permute.xlu0 %191 }
  0xb6   :  { %v197_v20 = vsel %vm195_vm2, %v190_v55, %v192_v17  ;;  %v289_v23 = vsel %vm269_vm1, %v105_v15, %v239_v10 }
  0xb7   :  { %v266_v24 = vrot.slane %v197_v20, 4  ;;  %365 = vmatpush.bf16.msra.mxu0 %v289_v23 }
  0xb9   :  { %v334_v27 = vsel %vm269_vm1, %v178_v26, %v266_v24 }
  0xba   :  { %402 = vmatpush.bf16.msra.mxu3 %v334_v27 }
  0xbc   :  { %v213_v28 = vpop.permute.xlu2 %212  ;;  %v152_v29 = vpop.permute.xlu1 %151 }
  0xbd   :  { %v112_v30 = vpop.permute.xlu0 %111  ;;  %v220_v31 = vsel %vm214_vm0, %v213_v28, %v833_v22  ;;  %v215_v43 = vsel %vm214_vm0, %v211_v54, %v213_v28  ;;  %v160_v49 = vsel %vm157_vm4, %v844_v25, %v152_v29 }
  0xbe   :  { %v123_v32 = vsel %vm119_vm6, %v110_v3, %v112_v30  ;;  %v357_v48 = vsel %vm269_vm1, %v220_v31, 0  ;;  %v253_v55 = vrot.slane %v160_v49, 4 }
  0xbf   :  { %v240_v34 = vrot.slane %v123_v32, 4 }
  0xc1   :  { %v292_v36 = vsel %vm269_vm1, %v104_v35, %v240_v34 }
  0xc2   :  { %378 = vmatpush.bf16.msra.mxu1 %v292_v36 }
  0xc4   :  { %v194_v37 = vpop.permute.xlu2 %193  ;;  %v70_v38 = vpop.permute.xlu1 %69 }
  0xc5   :  { %v85_v39 = vsel %vm81_vm8, %v70_v38, %v903_v11  ;;  %v930_v22 = vpop.permute.xlu0 %67  ;;  %v196_v45 = vsel %vm195_vm2, %v192_v17, %v194_v37  ;;  %v201_v46 = vsel %vm195_vm2, %v194_v37, %v831_v21 }
  0xc6   :  { %v228_v40 = vrot.slane %v85_v39, 4  ;;  %v86_v41 = vsel %vm81_vm8, %v930_v22, %v70_v38  ;;  %v267_v21 = vrot.slane %v196_v45, 4 }
  0xc7   :  { %v227_v42 = vrot.slane %v86_v41, 4 }
  0xc8   :  { %v274_v44 = vsel %vm269_vm1, %v732_v7, %v228_v40  ;;  %v355_v7 = vsel %vm269_vm1, %v215_v43, 0 }
  0xc9   :  { %v271_v47 = vsel %vm269_vm1, %v724_v5, %v227_v42  ;;  %379 = vmatpush.bf16.msra.mxu1 %v274_v44  ;;  %v268_v5 = vrot.slane %v201_v46, 4 }
  0xca   :  { %366 = vmatpush.bf16.msra.mxu0 %v271_v47 }
  0xcc   :  { %v175_v52 = vpop.permute.xlu2 %174  ;;  %v154_v54 = vpop.permute.xlu1 %153  ;;  %583 = vmatmul.msk.bf16.vlgmr.msra.gmra.mxu1 %vm343_vm9, %v954_v51 }
  0xcd   :  { %427 = vmatpush.bf16.msrb.mxu1 %v357_v48  ;;  %v177_v25 = vsel %vm176_vm3, %v880_v53, %v175_v52  ;;  %v182_v56 = vsel %vm176_vm3, %v175_v52, %v812_v16  ;;  %v133_v57 = vpop.permute.xlu0 %132  ;;  %582 = vmatmul.msk.bf16.vlgmr.msra.gmra.mxu0 %vm343_vm9, %v954_v51  ;;  %v159_v53 = vsel %vm157_vm4, %v152_v29, %v154_v54 }
  0xce   :  { %414 = vmatpush.bf16.msrb.mxu0 %v355_v7  ;;  %v141_v58 = vsel %vm138_vm5, %v131_v1, %v133_v57  ;;  %v337_v59 = vsel %vm269_vm1, %v177_v25, %v267_v21  ;;  %v340_v60 = vsel %vm269_vm1, %v182_v56, %v268_v5  ;;  %v254_v16 = vrot.slane %v159_v53, 4 }
  0xcf   :  { %v313_v61 = vsel %vm269_vm1, %v141_v58, %v253_v55 }
  0xd0   :  { %390 = vmatpush.bf16.msra.mxu2 %v313_v61 }
  0xd1   :  { %428 = vmatpush.bf16.msrb.mxu1 %v340_v60 }
  0xd2   :  { %415 = vmatpush.bf16.msrb.mxu0 %v337_v59 }
  0xd4   :  { %v137_v62 = vpop.permute.xlu2 %136  ;;  %v135_v63 = vpop.permute.xlu1 %134 }
  0xd5   :  { %v144_v2 = vsel %vm138_vm5, %v137_v62, %v874_v50  ;;  %v140_v1 = vsel %vm138_vm5, %v133_v57, %v135_v63  ;;  %v114_v3 = vpop.permute.xlu0 %113  ;;  %v684_v57 = vmov 0.0  }
  0xd6   :  { %v316_v6 = vsel %vm269_vm1, %v140_v1, %v254_v16  ;;  %v122_v8 = vsel %vm119_vm6, %v112_v30, %v114_v3  ;;  %41 = vst.msk [vmem:[#allocation2] sm:$0xff] %vm40_vm10, %v684_v57 }
  0xd7   :  { %403 = vmatpush.bf16.msra.mxu3 %v316_v6  ;;  %v241_v15 = vrot.slane %v122_v8, 4  ;;  %42 = vst.msk [vmem:[#allocation3] sm:$0xff] %vm40_vm10, %v684_v57 }
  0xdc   :  { %v116_v10 = vpop.permute.xlu1 %115  ;;  %v78_v42 = vpop.permute.xlu2 %77 }
  0xdd   :  { %v95_v17 = vpop.permute.xlu0 %94  ;;  %v121_v50 = vsel %vm119_vm6, %v114_v3, %v116_v10  ;;  %v87_v45 = vsel %vm81_vm8, %v78_v42, %v930_v22 }
  0xde   :  { %v103_v20 = vsel %vm100_vm7, %v893_v0, %v95_v17  ;;  %v242_v24 = vrot.slane %v121_v50, 4  ;;  %v232_v22 = vrot.slane %v87_v45, 4 }
  0xdf   :  { %v295_v23 = vsel %vm269_vm1, %v103_v20, %v241_v15 }
  0xe0   :  { %391 = vmatpush.bf16.msra.mxu2 %v295_v23  ;;  %v286_v55 = vsel %vm269_vm1, %v798_v14, %v232_v22 }
  0xe4   :  { %v97_v26 = vpop.permute.xlu1 %96 }
  0xe5   :  { %v102_v27 = vsel %vm100_vm7, %v95_v17, %v97_v26  ;;  %v74_v28 = vpop.permute.xlu0 %73 }
  0xe6   :  { %v84_v29 = vsel %vm81_vm8, %v903_v11, %v74_v28  ;;  %v298_v30 = vsel %vm269_vm1, %v102_v27, %v242_v24 }
  0xe7   :  { %v229_v31 = vrot.slane %v84_v29, 4  ;;  %404 = vmatpush.bf16.msra.mxu3 %v298_v30 }
  0xe9   :  { %v277_v0 = vsel %vm269_vm1, %v722_v4, %v229_v31  ;;  %v139_v4 = vsel %vm138_vm5, %v135_v63, %v137_v62 }
  0xea   :  { %392 = vmatpush.bf16.msra.mxu2 %v277_v0 }
  0xec   :  { %v156_v32 = vpop.permute.xlu1 %155 }
  0xed   :  { %v158_v34 = vsel %vm157_vm4, %v154_v54, %v156_v32  ;;  %v163_v35 = vsel %vm157_vm4, %v156_v32, %v820_v18  ;;  %584 = vmatmul.msk.bf16.vlgmr.msra.gmra.mxu2 %vm343_vm9, %v954_v51  ;;  %v76_v11 = vpop.permute.xlu0 %75 }
  0xee   :  { %v255_v36 = vrot.slane %v158_v34, 4  ;;  %v256_v37 = vrot.slane %v163_v35, 4  ;;  %v83_v38 = vsel %vm81_vm8, %v74_v28, %v76_v11  ;;  %v82_v46 = vsel %vm81_vm8, %v76_v11, %v78_v42 }
  0xef   :  { %v230_v39 = vrot.slane %v83_v38, 4  ;;  %v231_v5 = vrot.slane %v82_v46, 4 }
  0xf0   :  { %v319_v40 = vsel %vm269_vm1, %v139_v4, %v255_v36  ;;  %v322_v41 = vsel %vm269_vm1, %v144_v2, %v256_v37  ;;  %v471_v4 = vld [vmem:[#allocation2] sm:$0xff] }
  0xf1   :  { %v280_v18 = vsel %vm269_vm1, %v746_v9, %v230_v39  ;;  %416 = vmatpush.bf16.msrb.mxu0 %v319_v40  ;;  %429 = vmatpush.bf16.msrb.mxu1 %v322_v41  ;;  %v482_v40 = vld [vmem:[#allocation3] sm:$0xff] }
  0xf2   :  { %405 = vmatpush.bf16.msra.mxu3 %v280_v18 }
  0xf4   :  { %v99_v43 = vpop.permute.xlu1 %98 }
  0xf5   :  { %585 = vmatmul.msk.bf16.vlgmr.msra.gmra.mxu3 %vm343_vm9, %v954_v51  ;;  %v118_v44 = vpop.permute.xlu0 %117  ;;  %v101_v7 = vsel %vm100_vm7, %v97_v26, %v99_v43  ;;  %v106_v21 = vsel %vm100_vm7, %v99_v43, %v905_v13 }
  0xf6   :  { %v120_v47 = vsel %vm119_vm6, %v116_v10, %v118_v44  ;;  %v125_v9 = vsel %vm119_vm6, %v118_v44, %v858_v33  ;;  %v283_v33 = vsel %vm269_vm1, %v760_v12, %v231_v5  ;;  %v451_v12 = vld [vmem:[%s1055_s2] sm:$0x3f] }
  0xf7   :  { %v243_v48 = vrot.slane %v120_v47, 4  ;;  %v244_v49 = vrot.slane %v125_v9, 4  ;;  %v453_v14 = vperm.slane %v451_v12, 0  ;;  %v454_v58 = vperm.slane %v451_v12, 1 }
  0xf8   :  { %v455_v61 = vperm.slane %v451_v12, 2  ;;  %v456_v53 = vperm.slane %v451_v12, 3  ;;  %v457_v15 = vperm.slane %v451_v12, 4  ;;  %v458_v17 = vperm.slane %v451_v12, 5 }
  0xf9   :  { %v301_v52 = vsel %vm269_vm1, %v101_v7, %v243_v48  ;;  %v304_v54 = vsel %vm269_vm1, %v106_v21, %v244_v49 }
  0xfa   :  { %417 = vmatpush.bf16.msrb.mxu0 %v301_v52  ;;  %430 = vmatpush.bf16.msrb.mxu1 %v304_v54  ;;  %v519_v54 = vld [vmem:[%s1056_s3] sm:$0xff] }
  0xfe   :  { %418 = vmatpush.bf16.msrb.mxu0 %v283_v33  ;;  %431 = vmatpush.bf16.msrb.mxu1 %v286_v55 }
 0x101   :  { %586 = vmatmul.msk.bf16.vlgmr.msrb.gmra.mxu0 %vm343_vm9, %v954_v51  ;;  %587 = vmatmul.msk.bf16.vlgmr.msrb.gmra.mxu1 %vm343_vm9, %v954_v51 }
 0x149   :  { %v381_v19 = vpop.f32.mrf.mxu1 }
 0x14a   :  { %v368_v13 = vpop.f32.mrf.mxu0  ;;  %442 = vst [vmem:[#allocation7 + $0x8] sm:$0xff] %v381_v19  ;;  %v466_v60 = vmul.f32 %v454_v58, %v381_v19 }
 0x14b   :  { %441 = vst [vmem:[#allocation7] sm:$0xff] %v368_v13  ;;  %v465_v51 = vmul.f32 %v453_v14, %v368_v13  ;;  %v521_v13 = vld [vmem:[%s1057_s4] sm:$0xff] }
 0x14c   :  { %v484_v62 = vmul.f32 %v466_v60, %v466_v60 }
 0x14d   :  { %v483_v16 = vmul.f32 %v465_v51, %v465_v51  ;;  %v472_v3 = vadd.f32 %v466_v60, %v465_v51 }
 0x14f   :  { %v489_v8 = vadd.f32 %v484_v62, %v483_v16 }
 0x151   :  { %v383_v25 = vpop.f32.mrf.mxu1 }
 0x152   :  { %v370_v56 = vpop.f32.mrf.mxu0 }
 0x170   :  { %v394_v59 = vpop.f32.mrf.mxu2 }
 0x171   :  { %443 = vst [vmem:[#allocation7 + $0x10] sm:$0xff] %v394_v59  ;;  %v467_v63 = vmul.f32 %v455_v61, %v394_v59 }
 0x173   :  { %v485_v10 = vmul.f32 %v467_v63, %v467_v63  ;;  %v473_v20 = vadd.f32 %v472_v3, %v467_v63 }
 0x175   :  { %v490_v26 = vadd.f32 %v489_v8, %v485_v10 }
 0x178   :  { %v407_v2 = vpop.f32.mrf.mxu3  ;;  %v396_v1 = vpop.f32.mrf.mxu2 }
 0x179   :  { %448 = vst [vmem:[#allocation7 + $0x18] sm:$0xff] %v407_v2  ;;  %v468_v6 = vmul.f32 %v456_v53, %v407_v2 }
 0x17b   :  { %v486_v23 = vmul.f32 %v468_v6, %v468_v6  ;;  %v474_v27 = vadd.f32 %v473_v20, %v468_v6 }
 0x17d   :  { %v491_v34 = vadd.f32 %v490_v26, %v486_v23 }
 0x17e   :  { %v420_v50 = vpop.f32.mrf.mxu0  ;;  %v433_v24 = vpop.f32.mrf.mxu1 }
 0x17f   :  { %449 = vst [vmem:[#allocation7 + $0x20] sm:$0xff] %v420_v50  ;;  %v469_v28 = vmul.f32 %v457_v15, %v420_v50  ;;  %v470_v29 = vmul.f32 %v458_v17, %v433_v24 }
 0x180   :  { %450 = vst [vmem:[#allocation7 + $0x28] sm:$0xff] %v433_v24  ;;  %v409_v30 = vpop.f32.mrf.mxu3 }
 0x181   :  { %v487_v31 = vmul.f32 %v469_v28, %v469_v28  ;;  %v475_v0 = vadd.f32 %v474_v27, %v469_v28  ;;  %v488_v32 = vmul.f32 %v470_v29, %v470_v29 }
 0x183   :  { %v476_v35 = vadd.f32 %v475_v0, %v470_v29  ;;  %v492_v11 = vadd.f32 %v491_v34, %v487_v31 }
 0x185   :  { %477 = vadd.xlane.f32.xlu0 %v476_v35  ;;  %v493_v36 = vadd.f32 %v492_v11, %v488_v32 }
 0x186   :  { %v422_v37 = vpop.f32.mrf.mxu0  ;;  %v435_v38 = vpop.f32.mrf.mxu1 }
 0x187   :  { %494 = vadd.xlane.f32.xlu1 %v493_v36 }
 0x1f8   :  { %v478_v39 = vpop.xlane.xlu0 %477 }
 0x1f9   :  { %v479_v41 = vadd.f32 %v478_v39, %v471_v4 }
 0x1fa   :  { %v495_v18 = vpop.xlane.xlu1 %494 }
 0x1fb   :  { %481 = vst.msk [vmem:[#allocation2] sm:$0xff] %vm40_vm10, %v479_v41  ;;  %v496_v42 = vadd.f32 %v495_v18, %v482_v40 }
 0x1fd   :  { %497 = vst.msk [vmem:[#allocation3] sm:$0xff] %vm40_vm10, %v496_v42 }
 0x202   :  { %v501_v43 = vld [vmem:[#allocation2] sm:$0xff] }
 0x203   :  { %v502_v44 = vmul.f32 0.001953125, %v501_v43 }
 0x204   :  { %v503_v45 = vld [vmem:[#allocation3] sm:$0xff] }
 0x205   :  { %v505_v46 = vmul.f32 %v502_v44, %v502_v44  ;;  %v504_v47 = vmul.f32 0.001953125, %v503_v45 }
 0x207   :  { %v506_v9 = vsub.f32 %v504_v47, %v505_v46 }
 0x209   :  { %v507_v48 = vmax.f32 %v506_v9, 0.0 }
 0x20b   :  { %v508_v49 = vadd.f32 1e-05, %v507_v48 }
 0x20d   :  { %612 = vrsqrt.f32 %v508_v49  ;;  %vm515_vm12 = vweird.f32 %v508_v49 }
 0x213   :  { %v613_v7 = vpop.eup %612 }
 0x214   :  { %v510_v21 = vmul.f32 %v613_v7, %v508_v49  ;;  %vm516_vm11 = vweird.f32 %v613_v7 }
 0x215   :  { %vm517_vm13 = vmor %vm515_vm12, %vm516_vm11 }
 0x216   :  { %v511_v22 = vmul.f32 %v613_v7, %v510_v21 }
 0x218   :  { %v512_v5 = vmul.f32 0.5, %v511_v22 }
 0x21a   :  { %v513_v52 = vsub.f32 1.5, %v512_v5 }
 0x21c   :  { %v514_v33 = vmul.f32 %v613_v7, %v513_v52 }
 0x21e   :  { %v518_v55 = vsel %vm517_vm13, %v613_v7, %v514_v33 }
 0x21f   :  { %v520_v19 = vmul.f32 %v519_v54, %v518_v55 }
 0x221   :  { %v522_v25 = vmul.f32 %v520_v19, %v502_v44 }
 0x223   :  { %v523_v56 = vsub.f32 %v521_v13, %v522_v25 }
 0x224 LB: > { %v685_v57 = vmov 0   ;;  %s589_s3 = smul.u32 24, %s673_s11  ;;  %s529_s11 = sadd.s32 1, %s673_s11   ;;  %s673_s11 = sphi %s671_s11, %s529_s11  }
 0x225   : > { %614 = vset.pattern.permute.xlu0 %v685_v57  ;;  %p526_p0 = scmp.ge.s32.totalorder %s529_s11, 2  }
 0x226   : > { %538 = vperm.xlu0 %614, %v520_v19   ;;  %s532_s12 = scalar_lea.vmem [#allocation7], %s589_s3  ;;  %s561_s14 = sshll.u32 (%p526_p0), %s1058_s5, 4  ;;  %s562_s14 = int_to_ptr.hbm [resolvable:$true] %s561_s14 }
 0x227   : > { %v533_v14 = vld [vmem:[%s532_s12] sm:$0xff]  ;;  %v534_v58 = vld [vmem:[%s532_s12 + $0x8] sm:$0xff]  ;;  %v535_v59 = vld [vmem:[%s532_s12 + $0x10] sm:$0xff]  ;;  %s686_s15 = smov (%p526_p0), [#allocation7]   ;;  %s687_s17 = smov (%p526_p0), 384  }
 0x228   :  { %s559_s16 = sshll.u32 (%p526_p0), %s686_s15, 4  ;;  %s688_s18 = smov (%p526_p0), 24   ;;  %s560_s16 = int_to_ptr.vmem [resolvable:$true] %s559_s16 }
 0x22e   : > { %546 = vperm.xlu0 %614, %v523_v56  }
 0x298   : > { %v539_v12 = vpop.permute.xlu0 %538 }
 0x299   : > { %v541_v51 = vmul.f32 %v539_v12, %v533_v14  ;;  %v542_v60 = vmul.f32 %v539_v12, %v534_v58  ;;  %v543_v61 = vmul.f32 %v539_v12, %v535_v59 }
 0x2a0   : > { %v547_v53 = vpop.permute.xlu0 %546 }
 0x2a1   : > { %v549_v16 = vadd.f32 %v547_v53, %v541_v51  ;;  %v550_v62 = vadd.f32 %v547_v53, %v542_v60  ;;  %v551_v63 = vadd.f32 %v547_v53, %v543_v61  ;;  %528 = sbr.rel (!%p526_p0) target bundleno = 548 (0x224), region = 62 }
 0x2a3   : > { %552 = vst [vmem:[%s532_s12] sm:$0xff] %v549_v16 }
 0x2a4   : > { %553 = vst [vmem:[%s532_s12 + $0x8] sm:$0xff] %v550_v62 }
 0x2a5   : > { %554 = vst [vmem:[%s532_s12 + $0x10] sm:$0xff] %v551_v63 }
 0x2a6   :  { %567 = dma.vmem_to_hbm [thread:$0]  %s560_s16, 768, %s562_s14, [#allocation6], %s687_s17, %s687_s17, %s688_s18  }
 0x2a7   :  { %669 = dma.done.wait [#allocation6], 768  }
 0x2a8   :  { %670 = vsyncadd [#allocation6], 4294966528 }
 0x2a9   :  { %572 = vsyncpa [#allocation5], 1 }
 0x2aa   :  { %573 = vsyncpa [#allocation6], 1 }

</bundles_post_ra>
